<compile_context>
chip_gen: v7x
topology: tpu7x:2x2x1
jax: 0.10.0
libtpu: 0.0.40
codegen_flags: <defaults>
</compile_context>

<pallas_src>
import functools

import numpy as np

import jax
import jax.numpy as jnp
from jax.experimental import pallas as pl
from jax.experimental.pallas import tpu as pltpu


def make_kernel(k):
    """JAX port of model_v4.make_kernel."""
    k = jnp.asarray(k, dtype=jnp.float32)
    if k.ndim == 1:
        k = k[None, :] * k[:, None]
    k = k / jnp.sum(k)
    return k


# --------------------------------------------------------------------------
# shared tap accumulation (values already in VMEM/vregs)
# --------------------------------------------------------------------------
def _fir_accumulate(xp, out_rows, out_cols, taps_h, taps_w, taps_2d):
    """xp: (Cb, R, Wp) value (input dtype). Returns (Cb, out_rows, out_cols) f32."""
    f32 = jnp.float32
    if taps_h is not None:
        # Separable: 1-D H pass (sublane shifts), then 1-D W pass (lane shifts).
        tmp = taps_h[0] * xp[:, 0:out_rows, :].astype(f32)
        for dy in range(1, len(taps_h)):
            tmp = tmp + taps_h[dy] * xp[:, dy:dy + out_rows, :].astype(f32)
        acc = taps_w[0] * tmp[:, :, 0:out_cols]
        for dx in range(1, len(taps_w)):
            acc = acc + taps_w[dx] * tmp[:, :, dx:dx + out_cols]
    else:
        kh, kw = taps_2d.shape
        acc = None
        for dy in range(kh):
            for dx in range(kw):
                t = float(taps_2d[dy, dx])
                if t == 0.0:
                    continue
                term = t * xp[:, dy:dy + out_rows, dx:dx + out_cols].astype(f32)
                acc = term if acc is None else acc + term
        if acc is None:
            acc = jnp.zeros((xp.shape[0], out_rows, out_cols), f32)
    return acc


# --------------------------------------------------------------------------
# Path A kernel: one full (Cb, H, W) plane per grid step, NCHW blocks
# --------------------------------------------------------------------------
def _blur_kernel_full(x_ref, o_ref, *scratch, taps_h, taps_w, taps_2d,
                      Ho, Wo, Hp, Wp, src, dst, size):
    """x_ref: (1, Cb, H, W); o_ref: (1, Cb, Ho, Wo); scratch: optional pad buf."""
    (sh, sw), (dh, dw), (Hc, Wc) = src, dst, size
    Cb = x_ref.shape[1]

    if scratch:
        pad_ref = scratch[0]                      # (Cb, Hp, Wp), input dtype
        # Zero only the constant border strips (every step; see header note on
        # why @pl.when(first step) is unsafe under megacore grid splitting).
        if dh > 0:
            pad_ref[:, 0:dh, :] = jnp.zeros((Cb, dh, Wp), pad_ref.dtype)
        if dh + Hc < Hp:
            pad_ref[:, dh + Hc:Hp, :] = jnp.zeros(
                (Cb, Hp - dh - Hc, Wp), pad_ref.dtype)
        if dw > 0:
            pad_ref[:, dh:dh + Hc, 0:dw] = jnp.zeros((Cb, Hc, dw), pad_ref.dtype)
        if dw + Wc < Wp:
            pad_ref[:, dh:dh + Hc, dw + Wc:Wp] = jnp.zeros(
                (Cb, Hc, Wp - dw - Wc), pad_ref.dtype)
        # Interior: (cropped) input rows/cols, stored in the input dtype.
        pad_ref[:, dh:dh + Hc, dw:dw + Wc] = x_ref[0, :, sh:sh + Hc, sw:sw + Wc]
        xp = pad_ref[...]
    else:
        # No positive padding anywhere: read the (possibly cropped) input.
        xp = x_ref[0, :, sh:sh + Hc, sw:sw + Wc]

    acc = _fir_accumulate(xp, Ho, Wo, taps_h, taps_w, taps_2d)
    o_ref[0, :, :, :] = acc.astype(o_ref.dtype)


# --------------------------------------------------------------------------
# Path B kernel: H-tiled fallback, manual halo DMA from HBM (pl.ANY input)
# --------------------------------------------------------------------------
def _blur_kernel_rows(x_hbm, o_ref, row_buf, *, taps_h, taps_w, taps_2d,
                      Cb, Th, Rp, Wo, Wp, src_w0, dst_w0, Wc):
    """x_hbm: (N, C, Hp_pad, W) HBM ref (H pre-padded); o_ref: (1, Cb, Th, Wo)."""
    n = pl.program_id(0)
    c0 = pl.program_id(1) * Cb
    r0 = pl.multiple_of(pl.program_id(2) * Th, Th)

    # Zero only the constant left/right padding columns (H is pre-padded for
    # this fallback path, so every halo row is a data row).
    if dst_w0 > 0:
        row_buf[:, :, 0:dst_w0] = jnp.zeros((Cb, Rp, dst_w0), row_buf.dtype)
    if dst_w0 + Wc < Wp:
        row_buf[:, :, dst_w0 + Wc:Wp] = jnp.zeros(
            (Cb, Rp, Wp - dst_w0 - Wc), row_buf.dtype)

    # DMA the (Th + kh - 1)-row halo window for this (n, channel, row) tile.
    pltpu.sync_copy(
        x_hbm.at[n, pl.ds(c0, Cb), pl.ds(r0, Rp), pl.ds(src_w0, Wc)],
        row_buf.at[:, :, pl.ds(dst_w0, Wc)])

    acc = _fir_accumulate(row_buf[...], Th, Wo, taps_h, taps_w, taps_2d)
    o_ref[0, :, :, :] = acc.astype(o_ref.dtype)


# --------------------------------------------------------------------------
# planning helpers (generation-aware VMEM sizing, tile picking)
# --------------------------------------------------------------------------
def _vmem_plan():
    """Returns (vmem_limit_bytes, tile_budget_bytes) from real chip capacity."""
    try:
        cap = int(pltpu.get_tpu_info().vmem_capacity_bytes)
    except Exception:
        cap = 64 << 20                      # conservative: v7x per-TC capacity
    limit = min(int(cap * 0.75), cap - (16 << 20))   # 96 MiB on 128 MiB parts,
    limit = max(limit, 16 << 20)                     # 48 MiB on v7x
    budget = int(limit * 0.8)
    return limit, budget


def _divisors_desc(n):
    return [d for d in range(n, 0, -1) if n % d == 0]


def _plan_full_plane(N, C, H, W, Hp, Wp, Ho, Wo, itemsize, needs_pad, budget):
    """Largest channel tile whose per-step VMEM cost fits `budget`, else None."""
    def cost(cb):
        c = 2 * cb * H * W * itemsize              # input block (double-buffered)
        c += 2 * cb * Ho * Wo * itemsize           # output block (double-buffered)
        if needs_pad:
            c += cb * Hp * Wp * itemsize           # pad scratch (single)
        c += cb * (Hp * Wp + Ho * Wp + Ho * Wo) * 4  # live f32 temporaries
        return c

    fitting = [d for d in _divisors_desc(C) if cost(d) <= budget]
    if not fitting:
        return None
    cb = fitting[0]
    # v7x has two TensorCores; prefer >= 2 parallel grid steps when possible.
    if N * (C // cb) < 2:
        smaller = [d for d in fitting if d < C]
        if smaller:
            cb = smaller[0]
    return cb


def _plan_row_tiles(C, kh, Ho, Wp, Wo, itemsize, budget, force_th=None):
    """Pick (channel tile, output-row tile) for the H-tiled fallback path."""
    def cost(cb, th):
        rp = th + kh - 1
        c = cb * rp * Wp * itemsize                # halo row scratch (single)
        c += 2 * cb * th * Wo * itemsize           # output block (double-buffered)
        c += cb * (rp * Wp + th * Wp + th * Wo) * 4
        return c

    ho8 = -(-Ho // 8) * 8
    if force_th is not None:
        ths = [int(force_th)]
    else:
        ths = sorted({min(t, ho8) for t in
                      (512, 384, 256, 192, 128, 96, 64, 48, 32, 16, 8)},
                     reverse=True)
    best = None
    for cb in _divisors_desc(C):
        for th in ths:                              # descending: first fit is best
            if cost(cb, th) <= budget:
                if best is None or cb * th > best[0] * best[1]:
                    best = (cb, th)
                break
    if best is None and force_th is not None:
        best = (1, int(force_th))
    return best


# --------------------------------------------------------------------------
# public wrapper
# --------------------------------------------------------------------------
def blur(x, kernel, pad, upsample_factor=1, *, force_row_tile=None):
    """Equivalent of Blur(kernel, pad, upsample_factor).forward(x); x is NCHW."""
    # `kernel` is a fixed registered buffer in the module -> bake the taps as
    # trace-time python constants (a different kernel triggers a recompile;
    # passing a traced/changing jnp array here is not supported).
    k = np.asarray(kernel, dtype=np.float64)
    assert k.ndim == 2, "blur kernel must be 2-D (make_kernel output)"
    if upsample_factor > 1:
        k = k * (upsample_factor ** 2)

    N, C, H, W = x.shape
    p0, p1 = pad
    kh, kw = k.shape

    Hp, Wp = H + p0 + p1, W + p0 + p1
    Ho, Wo = Hp - kh + 1, Wp - kw + 1
    assert Ho > 0 and Wo > 0, "pads too negative: empty output"

    # upfirdn2d flips the kernel before conv2d (cross-corr) -> true convolution.
    kf = np.ascontiguousarray(k[::-1, ::-1])

    # Rank-1 (separable) detection: make_kernel(1-D list) always yields this.
    taps_h = taps_w = None
    if kh > 1 and kw > 1:
        u, s, vt = np.linalg.svd(kf)
        if s[1] <= 1e-10 * max(s[0], 1e-30):
            taps_h = [float(v) for v in (u[:, 0] * np.sqrt(s[0]))]
            taps_w = [float(v) for v in (vt[0, :] * np.sqrt(s[0]))]

    # Source crop (negative pads) / destination offset (positive pads).
    src_h0 = src_w0 = max(-p0, 0)
    dst_h0 = dst_w0 = max(p0, 0)
    Hc = H - max(-p0, 0) - max(-p1, 0)
    Wc = W - max(-p0, 0) - max(-p1, 0)
    assert Hc > 0 and Wc > 0, "pads too negative: input fully cropped"
    needs_pad = (max(p0, 0) > 0) or (max(p1, 0) > 0)

    itemsize = x.dtype.itemsize
    vmem_limit, budget = _vmem_plan()

    # ---------------- Path A: full-plane blocks, fully auto-pipelined --------
    Cb = None
    if force_row_tile is None:
        Cb = _plan_full_plane(N, C, H, W, Hp, Wp, Ho, Wo, itemsize,
                              needs_pad, budget)

    if Cb is not None:
        kern = functools.partial(
            _blur_kernel_full,
            taps_h=taps_h, taps_w=taps_w, taps_2d=kf,
            Ho=Ho, Wo=Wo, Hp=Hp, Wp=Wp,
            src=(src_h0, src_w0), dst=(dst_h0, dst_w0), size=(Hc, Wc))
        scratch = [pltpu.VMEM((Cb, Hp, Wp), x.dtype)] if needs_pad else []
        return pl.pallas_call(
            kern,
            out_shape=jax.ShapeDtypeStruct((N, C, Ho, Wo), x.dtype),
            grid=(N, C // Cb),
            in_specs=[pl.BlockSpec((1, Cb, H, W), lambda n, c: (n, c, 0, 0))],
            out_specs=pl.BlockSpec((1, Cb, Ho, Wo), lambda n, c: (n, c, 0, 0)),
            scratch_shapes=scratch,
            compiler_params=pltpu.CompilerParams(
                dimension_semantics=("parallel", "parallel"),
                vmem_limit_bytes=vmem_limit),
        )(x)

    # ---------------- Path B: H-tiled fallback (manual halo DMA) -------------
    plan = _plan_row_tiles(C, kh, Ho, Wp, Wo, itemsize, budget,
                           force_th=force_row_tile)
    assert plan is not None, "could not find a row/channel tiling fitting VMEM"
    Cb, Th = plan
    Rp = Th + kh - 1
    Ho_pad = -(-Ho // Th) * Th
    Hp_pad = Ho_pad + kh - 1

    # TODO(synk): fold this H pre-pad/crop (one extra HBM pass, fallback path
    # only) into the kernel DMA by clamping the halo window at the grid edges.
    xH = x[:, :, src_h0:src_h0 + Hc, :]
    xH = jnp.pad(xH, ((0, 0), (0, 0), (dst_h0, Hp_pad - dst_h0 - Hc), (0, 0)))

    kern = functools.partial(
        _blur_kernel_rows,
        taps_h=taps_h, taps_w=taps_w, taps_2d=kf,
        Cb=Cb, Th=Th, Rp=Rp, Wo=Wo, Wp=Wp,
        src_w0=src_w0, dst_w0=dst_w0, Wc=Wc)
    out = pl.pallas_call(
        kern,
        out_shape=jax.ShapeDtypeStruct((N, C, Ho_pad, Wo), x.dtype),
        grid=(N, C // Cb, Ho_pad // Th),
        in_specs=[pl.BlockSpec(memory_space=pl.ANY)],
        out_specs=pl.BlockSpec((1, Cb, Th, Wo), lambda n, c, h: (n, c, h, 0)),
        scratch_shapes=[pltpu.VMEM((Cb, Rp, Wp), x.dtype)],
        compiler_params=pltpu.CompilerParams(
            dimension_semantics=("parallel", "parallel", "arbitrary"),
            vmem_limit_bytes=vmem_limit),
    )(xH)
    return out if Ho_pad == Ho else out[:, :, :Ho, :]


# --------------------------------------------------------------------------
# pure-JAX reference (depthwise conv) for verification
# --------------------------------------------------------------------------
def _reference_blur(x, kernel, pad):
    N, C, H, W = x.shape
    p0, p1 = pad
    xp = jnp.pad(
        x, ((0, 0), (0, 0), (max(p0, 0), max(p1, 0)), (max(p0, 0), max(p1, 0))))
    hp_pos = H + max(p0, 0) + max(p1, 0)
    wp_pos = W + max(p0, 0) + max(p1, 0)
    xp = xp[:, :,
            max(-p0, 0):hp_pos - max(-p1, 0),
            max(-p0, 0):wp_pos - max(-p1, 0)]
    wflip = jnp.flip(jnp.asarray(kernel), (0, 1)).astype(jnp.float32)
    w = jnp.tile(wflip[None, None, :, :], (C, 1, 1, 1))     # (C, 1, kh, kw)
    return jax.lax.conv_general_dilated(
        xp.astype(jnp.float32), w, window_strides=(1, 1), padding="VALID",
        dimension_numbers=("NCHW", "OIHW", "NCHW"),
        feature_group_count=C).astype(x.dtype)


if __name__ == "__main__":
    key = jax.random.PRNGKey(0)

    # Small shapes consistent with the module: NCHW input.
    N, C, H, W = 2, 4, 16, 16
    x = jax.random.normal(key, (N, C, H, W), dtype=jnp.float32)

    # StyleGAN2-style Blur([1,3,3,1], pad=(2,1)).
    blur_k = make_kernel([1.0, 3.0, 3.0, 1.0])
    pad = (2, 1)

    # Main (full-plane) path.
    out = jax.block_until_ready(blur(x, blur_k, pad))
    ref = _reference_blur(x, blur_k, pad)
    assert out.shape == (N, C, H, W), out.shape
    assert jnp.allclose(out, ref, atol=1e-5, rtol=1e-5), "mismatch (full path)"

    # Row-tiled fallback path, forced at a small tile so it is exercised too.
    out_rt = jax.block_until_ready(blur(x, blur_k, pad, force_row_tile=8))
    assert jnp.allclose(out_rt, ref, atol=1e-5, rtol=1e-5), "mismatch (row path)"

    # Mixed positive/negative pad (crop) case.
    pad2 = (1, -1)
    out2 = jax.block_until_ready(blur(x, blur_k, pad2))
    ref2 = _reference_blur(x, blur_k, pad2)
    assert out2.shape == ref2.shape
    assert jnp.allclose(out2, ref2, atol=1e-5, rtol=1e-5), "mismatch (neg pad)"

    print("KERNEL_OK")
</pallas_src>

<mosaic_0001>
module attributes {stable_mosaic.version = 11 : i64} {
  func.func @_blur_kernel_full(%arg0: i32, %arg1: i32, %arg2: memref<1x4x16x16xf32, #tpu.memory_space<vmem>>, %arg3: memref<1x4x16x16xf32, #tpu.memory_space<vmem>>, %arg4: memref<4x19x19xf32, #tpu.memory_space<vmem>>) attributes {dimension_semantics = [#tpu.dimension_semantics<parallel>, #tpu.dimension_semantics<parallel>], iteration_bounds = array<i64: 2, 1>, scalar_prefetch = 0 : i64, scratch_operands = 1 : i64, tpu.core_type = #tpu.core_type<tc>, window_params = [{transform_indices = @transform_0, window_bounds = array<i64: 1, 4, 16, 16>}, {transform_indices = @transform_1, window_bounds = array<i64: 1, 4, 16, 16>}]} {
    %cst = arith.constant 0.000000e+00 : f32
    %0 = vector.broadcast %cst : f32 to vector<4x2x19xf32>
    %c0 = arith.constant 0 : index
    %c0_0 = arith.constant 0 : index
    %c0_1 = arith.constant 0 : index
    %1 = vector.load %arg4[%c0, %c0_0, %c0_1] : memref<4x19x19xf32, #tpu.memory_space<vmem>>, vector<4x2x19xf32>
    tpu.vector_store %arg4[%c0, %c0_0, %c0_1], %0 {strides = array<i32>} : memref<4x19x19xf32, #tpu.memory_space<vmem>>, vector<4x2x19xf32>,
    %cst_2 = arith.constant 0.000000e+00 : f32
    %2 = vector.broadcast %cst_2 : f32 to vector<4x1x19xf32>
    %c0_3 = arith.constant 0 : index
    %c18 = arith.constant 18 : index
    %c0_4 = arith.constant 0 : index
    %3 = vector.load %arg4[%c0_3, %c18, %c0_4] : memref<4x19x19xf32, #tpu.memory_space<vmem>>, vector<4x1x19xf32>
    tpu.vector_store %arg4[%c0_3, %c18, %c0_4], %2 {strides = array<i32>} : memref<4x19x19xf32, #tpu.memory_space<vmem>>, vector<4x1x19xf32>,
    %cst_5 = arith.constant 0.000000e+00 : f32
    %4 = vector.broadcast %cst_5 : f32 to vector<4x16x2xf32>
    %c0_6 = arith.constant 0 : index
    %c2 = arith.constant 2 : index
    %c0_7 = arith.constant 0 : index
    %5 = vector.load %arg4[%c0_6, %c2, %c0_7] : memref<4x19x19xf32, #tpu.memory_space<vmem>>, vector<4x16x2xf32>
    tpu.vector_store %arg4[%c0_6, %c2, %c0_7], %4 {strides = array<i32>} : memref<4x19x19xf32, #tpu.memory_space<vmem>>, vector<4x16x2xf32>,
    %cst_8 = arith.constant 0.000000e+00 : f32
    %6 = vector.broadcast %cst_8 : f32 to vector<4x16x1xf32>
    %c0_9 = arith.constant 0 : index
    %c2_10 = arith.constant 2 : index
    %c18_11 = arith.constant 18 : index
    %7 = vector.load %arg4[%c0_9, %c2_10, %c18_11] : memref<4x19x19xf32, #tpu.memory_space<vmem>>, vector<4x16x1xf32>
    tpu.vector_store %arg4[%c0_9, %c2_10, %c18_11], %6 {strides = array<i32>} : memref<4x19x19xf32, #tpu.memory_space<vmem>>, vector<4x16x1xf32>,
    %c0_12 = arith.constant 0 : index
    %c0_13 = arith.constant 0 : index
    %c0_14 = arith.constant 0 : index
    %c0_15 = arith.constant 0 : index
    %8 = vector.load %arg2[%c0_12, %c0_13, %c0_14, %c0_15] : memref<1x4x16x16xf32, #tpu.memory_space<vmem>>, vector<1x4x16x16xf32>
    %9 = vector.shape_cast %8 : vector<1x4x16x16xf32> to vector<4x16x16xf32>
    %c0_16 = arith.constant 0 : index
    %c2_17 = arith.constant 2 : index
    %c2_18 = arith.constant 2 : index
    %10 = vector.load %arg4[%c0_16, %c2_17, %c2_18] : memref<4x19x19xf32, #tpu.memory_space<vmem>>, vector<4x16x16xf32>
    tpu.vector_store %arg4[%c0_16, %c2_17, %c2_18], %9 {strides = array<i32>} : memref<4x19x19xf32, #tpu.memory_space<vmem>>, vector<4x16x16xf32>,
    %c0_19 = arith.constant 0 : index
    %c0_20 = arith.constant 0 : index
    %c0_21 = arith.constant 0 : index
    %11 = vector.load %arg4[%c0_19, %c0_20, %c0_21] : memref<4x19x19xf32, #tpu.memory_space<vmem>>, vector<4x19x19xf32>
    %12 = vector.extract_strided_slice %11 {offsets = [0, 0, 0], sizes = [4, 16, 19], strides = [1, 1, 1]} : vector<4x19x19xf32> to vector<4x16x19xf32>
    %cst_22 = arith.constant -1.250000e-01 : f32
    %13 = vector.broadcast %cst_22 : f32 to vector<4x16x19xf32>
    %14 = arith.mulf %13, %12 : vector<4x16x19xf32>
    %15 = vector.extract_strided_slice %11 {offsets = [0, 1, 0], sizes = [4, 16, 19], strides = [1, 1, 1]} : vector<4x19x19xf32> to vector<4x16x19xf32>
    %cst_23 = arith.constant -3.750000e-01 : f32
    %16 = vector.broadcast %cst_23 : f32 to vector<4x16x19xf32>
    %17 = arith.mulf %16, %15 : vector<4x16x19xf32>
    %18 = arith.addf %14, %17 : vector<4x16x19xf32>
    %19 = vector.extract_strided_slice %11 {offsets = [0, 2, 0], sizes = [4, 16, 19], strides = [1, 1, 1]} : vector<4x19x19xf32> to vector<4x16x19xf32>
    %cst_24 = arith.constant -3.750000e-01 : f32
    %20 = vector.broadcast %cst_24 : f32 to vector<4x16x19xf32>
    %21 = arith.mulf %20, %19 : vector<4x16x19xf32>
    %22 = arith.addf %18, %21 : vector<4x16x19xf32>
    %23 = vector.extract_strided_slice %11 {offsets = [0, 3, 0], sizes = [4, 16, 19], strides = [1, 1, 1]} : vector<4x19x19xf32> to vector<4x16x19xf32>
    %cst_25 = arith.constant -1.250000e-01 : f32
    %24 = vector.broadcast %cst_25 : f32 to vector<4x16x19xf32>
    %25 = arith.mulf %24, %23 : vector<4x16x19xf32>
    %26 = arith.addf %22, %25 : vector<4x16x19xf32>
    %27 = vector.extract_strided_slice %26 {offsets = [0, 0, 0], sizes = [4, 16, 16], strides = [1, 1, 1]} : vector<4x16x19xf32> to vector<4x16x16xf32>
    %cst_26 = arith.constant -1.250000e-01 : f32
    %28 = vector.broadcast %cst_26 : f32 to vector<4x16x16xf32>
    %29 = arith.mulf %28, %27 : vector<4x16x16xf32>
    %30 = vector.extract_strided_slice %26 {offsets = [0, 0, 1], sizes = [4, 16, 16], strides = [1, 1, 1]} : vector<4x16x19xf32> to vector<4x16x16xf32>
    %cst_27 = arith.constant -3.750000e-01 : f32
    %31 = vector.broadcast %cst_27 : f32 to vector<4x16x16xf32>
    %32 = arith.mulf %31, %30 : vector<4x16x16xf32>
    %33 = arith.addf %29, %32 : vector<4x16x16xf32>
    %34 = vector.extract_strided_slice %26 {offsets = [0, 0, 2], sizes = [4, 16, 16], strides = [1, 1, 1]} : vector<4x16x19xf32> to vector<4x16x16xf32>
    %cst_28 = arith.constant -3.750000e-01 : f32
    %35 = vector.broadcast %cst_28 : f32 to vector<4x16x16xf32>
    %36 = arith.mulf %35, %34 : vector<4x16x16xf32>
    %37 = arith.addf %33, %36 : vector<4x16x16xf32>
    %38 = vector.extract_strided_slice %26 {offsets = [0, 0, 3], sizes = [4, 16, 16], strides = [1, 1, 1]} : vector<4x16x19xf32> to vector<4x16x16xf32>
    %cst_29 = arith.constant -1.250000e-01 : f32
    %39 = vector.broadcast %cst_29 : f32 to vector<4x16x16xf32>
    %40 = arith.mulf %39, %38 : vector<4x16x16xf32>
    %41 = arith.addf %37, %40 : vector<4x16x16xf32>
    %c0_30 = arith.constant 0 : index
    %c0_31 = arith.constant 0 : index
    %c0_32 = arith.constant 0 : index
    %c0_33 = arith.constant 0 : index
    %42 = vector.load %arg3[%c0_30, %c0_31, %c0_32, %c0_33] : memref<1x4x16x16xf32, #tpu.memory_space<vmem>>, vector<1x4x16x16xf32>
    %43 = vector.shape_cast %42 : vector<1x4x16x16xf32> to vector<4x16x16xf32>
    %44 = vector.shape_cast %41 : vector<4x16x16xf32> to vector<1x4x16x16xf32>
    tpu.vector_store %arg3[%c0_30, %c0_31, %c0_32, %c0_33], %44 {strides = array<i32>} : memref<1x4x16x16xf32, #tpu.memory_space<vmem>>, vector<1x4x16x16xf32>,
    return
  }
  func.func @transform_0(%arg0: i32, %arg1: i32) -> (i32, i32, i32, i32) {
    %c0_i32 = arith.constant 0 : i32
    %c0_i32_0 = arith.constant 0 : i32
    %c0_i32_1 = arith.constant 0 : i32
    return %arg0, %arg1, %c0_i32, %c0_i32_0 : i32, i32, i32, i32
  }
  func.func @transform_1(%arg0: i32, %arg1: i32) -> (i32, i32, i32, i32) {
    %c0_i32 = arith.constant 0 : i32
    %c0_i32_0 = arith.constant 0 : i32
    %c0_i32_1 = arith.constant 0 : i32
    return %arg0, %arg1, %c0_i32, %c0_i32_0 : i32, i32, i32, i32
  }
}

</mosaic_0001>

<bundles_post_ra>
// kernel: tpu_custom_call.1
= control target key start
LH: loop header
LB: loop body
LE: loop exit
PB: predicated region body
PF: predicated region fallthrough
CT: control target
= control target key end

     0   :  { %6 = vsyncpa [#allocation4], 0  ;;  %s1156_s0 = inlined_call_operand.hbm [shape: f32[2,4,16,16], index: 0, kind: input, shape index: {}]   ;;  %s1157_s1 = inlined_call_operand.hbm [shape: f32[2,4,16,16], index: 1, kind: output, shape index: {}]  }
   0x1   :  { %8 = vsyncpa [#allocation4 + $0x1], 0 }
   0x2   :  { %9 = vsyncpa [#allocation5], 0 }
   0x3   :  { %11 = vsyncpa [#allocation5 + $0x1], 0  ;;  %s868_s6 = smov 0   ;;  %s870_s7 = smov 0  }
   0x4   :  { %s872_s8 = smov 0   ;;  %s874_s9 = smov 0  }
   0x5   :  { %s876_s10 = smov 0   ;;  %s878_s11 = smov 0  }
   0x6 LB: > { %s645_s12 = sadd.s32 4294967295, %s845_s11   ;;  %s646_s13 = sadd.s32 4294967294, %s845_s11   ;;  %s845_s11 = sphi %s878_s11, %s17_s11   ;;  %s841_s10 = sphi %s876_s10, %s1172_s10   ;;  %s837_s9 = sphi %s874_s9, %s1171_s9   ;;  %s833_s8 = sphi %s872_s8, %s1170_s8   ;;  %s829_s7 = sphi %s870_s7, %s1169_s7   ;;  %s825_s6 = sphi %s868_s6, %s1168_s6  }
   0x7   : > { %s29_s14 = sadd.s32 1, %s841_s10  ;;  %s38_s15 = sadd.s32 1, %s833_s8 }
   0x8   : > { %p31_p0 = scmp.ge.s32.totalorder %s29_s14, 2  ;;  %p45_p1 = scmp.ne.s32.totalorder %s833_s8, %s829_s7 }
   0x9   : > { %p46_p2 = scmp.eq.s32.totalorder %s845_s11, 0  ;;  %p51_p3 = scmp.ne.s32.totalorder %s829_s7, %s825_s6 }
   0xa   : > { %s1174_s14 = smov (%p31_p0, %s29_s14), 0  ;;  %p52_p5 = scmp.eq.s32.totalorder %s645_s12, 0 }
   0xb   : > { %p909_p4 = por %p46_p2, %p45_p1  ;;  %s33_s17 = ssub.s32 %s841_s10, %s1174_s14 }
   0xc   : > { %p77_p6 = scmp.eq.s32.totalorder %s645_s12, 1  ;;  %p36_p7 = scmp.eq.s32.totalorder %s33_s17, 0 }
   0xd   : > { %p915_p8 = por %p52_p5, %p51_p3  ;;  %p83_p10 = scmp.eq.s32.totalorder %s646_s13, 1 }
   0xe   : > { %p919_p9 = por %p77_p6, %p45_p1  ;;  %p674_p13 = scmp.lt.s32.totalorder %s845_s11, 2 }
   0xf   : > { %s924_s20 = scalar_select %p36_p7, %s833_s8, %s38_s15  }
  0x10   : > { %s1161_s19 = scalar_select %p919_p9, 1, 0 }
  0x11   : > { %p926_p11 = por %p83_p10, %p51_p3  ;;  %s103_s22 = sand.u32 1, %s833_s8  }
  0x12   : > { %s649_s23 = sshll.u32 %s103_s22, 6  ;;  %s660_s24 = sshll.u32 %s841_s10, 10 }
  0x13   : > { %s1162_s21 = scalar_select %p926_p11, 1, 0 }
  0x14   : > { %s937_s27 = scalar_lea.hbm %s1156_s0, %s660_s24  ;;  %s107_s28 = scalar_lea.vmem [#allocation3], %s649_s23 }
  0x15   : > { %s117_s29 = sshll.u32 %s107_s28, 4  ;;  %p943_p0 = pnand %p674_p13, %p909_p4  ;;  %s939_s29 = int_to_ptr.vmem [resolvable:$true] %s117_s29 }
  0x16   : > { %s948_s2 = scalar_lea.sflag [#allocation4], %s103_s22  ;;  %s733_s3 = scalar_lea.hbm %s937_s27, 1024 }
  0x17   : > { %p734_p2 = scmp.ne.s32.totalorder %s937_s27, %s733_s3  ;;  %p735_p3 = pneg %p943_p0 }
  0x18   : > { %s738_s12 = scalar_lea.hbm %s1156_s0, 2048  ;;  %p739_p4 = scmp.lt.u32.totalorder %s937_s27, %s1156_s0 }
  0x19   : > { %p736_p5 = pnand %p735_p3, %p734_p2  ;;  %p740_p7 = scmp.lt.u32.totalorder %s738_s12, %s733_s3 }
  0x1a   : > { %p742_p13 = scmp.lt.u32.totalorder %s733_s3, %s937_s27 }
  0x1b   : > { %p737_p6 = pneg %p736_p5  ;;  %p741_p10 = por %p740_p7, %p739_p4 }
  0x1d   : > { %p743_p12 = por %p742_p13, %p741_p10 }
  0x1f   : > { %p744_p1 = pnand %p743_p12, %p737_p6 }
  0x21   : > { %747 = shalt.err (!%p744_p1)
}
  0x22   : > { %s748_s16 = scalar_lea.vmem %s939_s29, 1024  ;;  %s847_s17 = smov [#allocation3]  }
  0x23   : > { %p749_p2 = scmp.ne.s32.totalorder %s939_s29, %s748_s16  ;;  %s753_s22 = sshll.u32 %s847_s17, 4  ;;  %s754_s22 = int_to_ptr.vmem [resolvable:$false] %s753_s22 }
  0x24   : > { %s755_s23 = scalar_lea.vmem %s754_s22, 2048  ;;  %p756_p9 = scmp.lt.s32.totalorder %s939_s29, %s754_s22 }
  0x25   : > { %p751_p5 = pnand %p749_p2, %p735_p3  ;;  %p757_p4 = scmp.lt.s32.totalorder %s755_s23, %s748_s16 }
  0x27   : > { %p752_p11 = pneg %p751_p5  ;;  %p758_p7 = por %p757_p4, %p756_p9 }
  0x29   : > { %p759_p10 = pnand %p758_p7, %p752_p11 }
  0x2b   : > { %762 = shalt.err (!%p759_p10)
}
  0x2c   : > { %s848_s24 = smov 128   ;;  %s849_s25 = smov 8  }
  0x2d   : > { %669 = dma.hbm_to_vmem [thread:$0]  (!%p943_p0), %s937_s27, 1024, %s939_s29, %s948_s2, %s848_s24, %s848_s24, %s849_s25  }
  0x2e   : > { %p125_p12 = scmp.lt.s32.totalorder %s845_s11, 3  ;;  %p1164_p1 = scmp.ge.s32.totalorder %s845_s11, 1 }
  0x30   : > { %p126_p3 = pnand %p1164_p1, %p125_p12 }
  0x31   : > { %s980_s26 = sand.u32 (!%p126_p3), 1, %s829_s7  }
  0x32   : > { %129 = sbr.rel (%p126_p3) target bundleno = 385 (0x181), region = 24  ;;  %s653_s28 = sshll.u32 (!%p126_p3), %s980_s26, 6 }
  0x33   : > { %s132_s3 = scalar_lea.sflag (!%p126_p3), [#allocation4], %s980_s26  ;;  %s986_s4 = scalar_lea.vmem (!%p126_p3), [#allocation3], %s653_s28 }
  0x39   : > { %816 = dma.done.wait (%p915_p8), %s132_s3, 1024  }
  0x3a   : > { %818 = vsyncadd (%p915_p8), %s132_s3, 4294966272  ;;  %vm166_vm0 = vcmask 15360   ;;  %vm175_vm1 = vcmask 154768   ;;  %v850_v0 = vmov 0.0   ;;  %vm161_vm2 = vcmask 147456   ;;  %v186_v1 = vld [vmem:[%s986_s4 + $0x10] sm:$0xff] }
  0x3b   : > { %169 = vst.msk [vmem:[#allocation2 + $0x1a] sm:$0xff] %vm166_vm0, %v850_v0  ;;  %167 = vst.msk [vmem:[#allocation2 + $0x2] sm:$0xff] %vm166_vm0, %v850_v0  ;;  %vm156_vm3 = vcmask 148480   ;;  %v184_v2 = vld [vmem:[%s986_s4] sm:$0xff]  ;;  %s851_s18 = smov 2   ;;  %v187_v3 = vld [vmem:[%s986_s4 + $0x18] sm:$0xff] }
  0x3c   : > { %168 = vst.msk [vmem:[#allocation2 + $0xa] sm:$0xff] %vm166_vm0, %v850_v0  ;;  %170 = vst.msk [vmem:[#allocation2 + $0x22] sm:$0xff] %vm166_vm0, %v850_v0  ;;  %204 = vrot.lane.b32.xlu1 %v186_v1, %s851_s18  ;;  %200 = vrot.lane.b32.xlu0 %v184_v2, %s851_s18  ;;  %v185_v4 = vld [vmem:[%s986_s4 + $0x8] sm:$0xff]  ;;  %v188_v6 = vld [vmem:[%s986_s4 + $0x20] sm:$0xff]  ;;  %vm224_vm4 = vcmask 146448   ;;  %vm277_vm5 = vcmask 1046528  }
  0x3d   : > { %171 = vst.msk [vmem:[#allocation2 + $0x32] sm:$0xff] %vm166_vm0, %v850_v0  ;;  %172 = vst.msk [vmem:[#allocation2 + $0x3a] sm:$0xff] %vm166_vm0, %v850_v0  ;;  %v189_v5 = vld [vmem:[%s986_s4 + $0x28] sm:$0xff]  ;;  %v191_v7 = vld [vmem:[%s986_s4 + $0x38] sm:$0xff]  ;;  %vm314_vm6 = vcmask 1045504   ;;  %vm367_vm7 = vcmask 1044480  }
  0x3e   : > { %173 = vst.msk [vmem:[#allocation2 + $0x4a] sm:$0xff] %vm166_vm0, %v850_v0  ;;  %174 = vst.msk [vmem:[#allocation2 + $0x52] sm:$0xff] %vm166_vm0, %v850_v0  ;;  %v190_v8 = vld [vmem:[%s986_s4 + $0x30] sm:$0xff]  ;;  %s852_s27 = smov 127   ;;  %s853_s29 = smov 126   ;;  %vm532_vm8 = vcmask 130048  }
  0x3f   : > { %178 = vst.msk [vmem:[#allocation2 + $0x1a] sm:$0xff] %vm175_vm1, %v850_v0  ;;  %176 = vst.msk [vmem:[#allocation2 + $0x2] sm:$0xff] %vm175_vm1, %v850_v0  ;;  %s854_s30 = smov 125   ;;  %s1082_s2 = scalar_lea.vmem [#allocation6], %s653_s28 }
  0x40   : > { %177 = vst.msk [vmem:[#allocation2 + $0xa] sm:$0xff] %vm175_vm1, %v850_v0  ;;  %179 = vst.msk [vmem:[#allocation2 + $0x22] sm:$0xff] %vm175_vm1, %v850_v0  ;;  %206 = vrot.lane.b32.xlu1 %v187_v3, %s851_s18  ;;  %202 = vrot.lane.b32.xlu0 %v185_v4, %s851_s18  ;;  %s661_s5 = sshll.u32 %s837_s9, 10  ;;  %s558_s12 = sshll.u32 %s1082_s2, 4  ;;  %s1105_s12 = int_to_ptr.vmem [resolvable:$true] %s558_s12 }
  0x41   : > { %180 = vst.msk [vmem:[#allocation2 + $0x32] sm:$0xff] %vm175_vm1, %v850_v0  ;;  %181 = vst.msk [vmem:[#allocation2 + $0x3a] sm:$0xff] %vm175_vm1, %v850_v0  ;;  %s1103_s16 = scalar_lea.hbm %s1157_s1, %s661_s5  ;;  %s542_s9 = scalar_lea.sflag [#allocation5], %s980_s26 }
  0x42   : > { %182 = vst.msk [vmem:[#allocation2 + $0x4a] sm:$0xff] %vm175_vm1, %v850_v0  ;;  %183 = vst.msk [vmem:[#allocation2 + $0x52] sm:$0xff] %vm175_vm1, %v850_v0  ;;  %s763_s17 = scalar_lea.vmem %s1105_s12, 1024  ;;  %p1165_p9 = scmp.ne.s32.totalorder %s1161_s19, 0 }
  0x43   : > { %162 = vst.msk [vmem:[#allocation2 + $0x12] sm:$0x1] %vm161_vm2, %v850_v0  ;;  %163 = vst.msk [vmem:[#allocation2 + $0x2a] sm:$0x1] %vm161_vm2, %v850_v0  ;;  %p764_p8 = scmp.ne.s32.totalorder %s1105_s12, %s763_s17  ;;  %s855_s22 = smov [#allocation6]  }
  0x44   : > { %164 = vst.msk [vmem:[#allocation2 + $0x42] sm:$0x1] %vm161_vm2, %v850_v0  ;;  %165 = vst.msk [vmem:[#allocation2 + $0x5a] sm:$0x1] %vm161_vm2, %v850_v0  ;;  %210 = vrot.lane.b32.xlu1 %v189_v5, %s851_s18  ;;  %208 = vrot.lane.b32.xlu0 %v188_v6, %s851_s18  ;;  %s767_s23 = sshll.u32 %s855_s22, 4  ;;  %s768_s23 = int_to_ptr.vmem [resolvable:$false] %s767_s23 }
  0x45   : > { %157 = vst.msk [vmem:[#allocation2] sm:$0x3] %vm156_vm3, %v850_v0  ;;  %158 = vst.msk [vmem:[#allocation2 + $0x18] sm:$0x3] %vm156_vm3, %v850_v0  ;;  %p765_p11 = pnand %p764_p8, %p1165_p9  ;;  %s769_s24 = scalar_lea.vmem %s768_s23, 2048 }
  0x46   : > { %159 = vst.msk [vmem:[#allocation2 + $0x30] sm:$0x3] %vm156_vm3, %v850_v0  ;;  %160 = vst.msk [vmem:[#allocation2 + $0x48] sm:$0x3] %vm156_vm3, %v850_v0  ;;  %p770_p6 = scmp.lt.s32.totalorder %s1105_s12, %s768_s23  ;;  %p771_p13 = scmp.lt.s32.totalorder %s769_s24, %s763_s17 }
  0x47   : > { %p766_p0 = pneg %p765_p11 }
  0x48   : > { %214 = vrot.lane.b32.xlu1 %v191_v7, %s851_s18  ;;  %212 = vrot.lane.b32.xlu0 %v190_v8, %s851_s18  ;;  %p772_p2 = por %p771_p13, %p770_p6 }
  0x4a   : > { %p773_p5 = pnand %p772_p2, %p766_p0 }
  0xae   : > { %v205_v9 = vpop.permute.xlu1 %204  ;;  %v201_v10 = vpop.permute.xlu0 %200 }
  0xaf   : > { %227 = vst.msk [vmem:[#allocation2 + $0x1a] sm:$0xff] %vm224_vm4, %v205_v9  ;;  %225 = vst.msk [vmem:[#allocation2 + $0x2] sm:$0xff] %vm224_vm4, %v201_v10 }
  0xb2   : > { %v207_v11 = vpop.permute.xlu1 %206  ;;  %v203_v12 = vpop.permute.xlu0 %202 }
  0xb3   : > { %228 = vst.msk [vmem:[#allocation2 + $0x22] sm:$0xff] %vm224_vm4, %v207_v11  ;;  %226 = vst.msk [vmem:[#allocation2 + $0xa] sm:$0xff] %vm224_vm4, %v203_v12 }
  0xb6   : > { %v211_v13 = vpop.permute.xlu1 %210  ;;  %v209_v14 = vpop.permute.xlu0 %208  ;;  %v233_v15 = vld [vmem:[#allocation2] sm:$0xff]  ;;  %v236_v16 = vld [vmem:[#allocation2 + $0x18] sm:$0xff] }
  0xb7   : > { %230 = vst.msk [vmem:[#allocation2 + $0x3a] sm:$0xff] %vm224_vm4, %v211_v13  ;;  %229 = vst.msk [vmem:[#allocation2 + $0x32] sm:$0xff] %vm224_vm4, %v209_v14  ;;  %v245_v17 = vmul.f32 -0.125, %v233_v15  ;;  %v253_v18 = vmul.f32 -0.375, %v233_v15  ;;  %v247_v19 = vmul.f32 -0.125, %v236_v16  ;;  %v256_v20 = vmul.f32 -0.375, %v236_v16 }
  0xb9   : > { %v278_v21 = vrot.slane %v253_v18, 1  ;;  %v315_v22 = vrot.slane %v253_v18, 2  ;;  %v368_v23 = vrot.slane %v245_v17, 3  ;;  %v283_v24 = vrot.slane %v256_v20, 1 }
  0xba   : > { %v215_v25 = vpop.permute.xlu1 %214  ;;  %v213_v26 = vpop.permute.xlu0 %212  ;;  %v234_v27 = vld [vmem:[#allocation2 + $0x8] sm:$0xff]  ;;  %v235_v28 = vld [vmem:[#allocation2 + $0x10] sm:$0x7]  ;;  %v237_v29 = vld [vmem:[#allocation2 + $0x20] sm:$0xff]  ;;  %v320_v30 = vrot.slane %v256_v20, 2  ;;  %v373_v31 = vrot.slane %v247_v19, 3 }
  0xbb   : > { %232 = vst.msk [vmem:[#allocation2 + $0x52] sm:$0xff] %vm224_vm4, %v215_v25  ;;  %231 = vst.msk [vmem:[#allocation2 + $0x4a] sm:$0xff] %vm224_vm4, %v213_v26  ;;  %v246_v32 = vmul.f32 -0.125, %v234_v27  ;;  %v254_v33 = vmul.f32 -0.375, %v234_v27  ;;  %v255_v34 = vmul.f32 -0.375, %v235_v28  ;;  %v351_v35 = vmul.f32 -0.125, %v235_v28 }
  0xbc   : > { %v238_v36 = vld [vmem:[#allocation2 + $0x28] sm:$0x7]  ;;  %v248_v37 = vmul.f32 -0.125, %v237_v29  ;;  %v257_v38 = vmul.f32 -0.375, %v237_v29 }
  0xbd   : > { %v258_v39 = vmul.f32 -0.375, %v238_v36  ;;  %v352_v40 = vmul.f32 -0.125, %v238_v36  ;;  %v279_v41 = vrot.slane %v254_v33, 1  ;;  %v281_v42 = vrot.slane %v255_v34, 1 }
  0xbe   : > { %v316_v43 = vrot.slane %v254_v33, 2  ;;  %v318_v44 = vrot.slane %v255_v34, 2  ;;  %v369_v45 = vrot.slane %v246_v32, 3  ;;  %v371_v46 = vrot.slane %v351_v35, 3  ;;  %v240_v1 = vld [vmem:[#allocation2 + $0x38] sm:$0xff]  ;;  %v239_v20 = vld [vmem:[#allocation2 + $0x30] sm:$0xff] }
  0xbf   : > { %v284_v47 = vrot.slane %v257_v38, 1  ;;  %v286_v48 = vrot.slane %v258_v39, 1  ;;  %v282_v49 = vsel %vm277_vm5, %v279_v41, %v281_v42  ;;  %v280_v51 = vsel %vm277_vm5, %v278_v21, %v279_v41  ;;  %v241_v2 = vld [vmem:[#allocation2 + $0x40] sm:$0x7] }
  0xc0   : > { %v319_v50 = vsel %vm314_vm6, %v316_v43, %v318_v44  ;;  %v317_v52 = vsel %vm314_vm6, %v315_v22, %v316_v43  ;;  %v307_v53 = vadd.f32 %v282_v49, %v246_v32  ;;  %v372_v54 = vsel %vm367_vm7, %v369_v45, %v371_v46 }
  0xc1   : > { %v306_v55 = vadd.f32 %v280_v51, %v245_v17  ;;  %v370_v56 = vsel %vm367_vm7, %v368_v23, %v369_v45  ;;  %v287_v57 = vsel %vm277_vm5, %v284_v47, %v286_v48  ;;  %v321_v58 = vrot.slane %v257_v38, 2 }
  0xc2   : > { %v323_v59 = vrot.slane %v258_v39, 2  ;;  %v374_v60 = vrot.slane %v248_v37, 3  ;;  %v344_v61 = vadd.f32 %v319_v50, %v307_v53  ;;  %v309_v63 = vadd.f32 %v287_v57, %v248_v37  ;;  %v243_v32 = vld [vmem:[#allocation2 + $0x50] sm:$0xff]  ;;  %v244_v33 = vld [vmem:[#allocation2 + $0x58] sm:$0x7]  ;;  %v242_v50 = vld [vmem:[#allocation2 + $0x48] sm:$0xff] }
  0xc3   : > { %v343_v62 = vadd.f32 %v317_v52, %v306_v55  ;;  %v376_v0 = vrot.slane %v352_v40, 3  ;;  %v285_v4 = vsel %vm277_vm5, %v283_v24, %v284_v47  ;;  %v322_v5 = vsel %vm314_vm6, %v320_v30, %v321_v58 }
  0xc4   : > { %v324_v3 = vsel %vm314_vm6, %v321_v58, %v323_v59  ;;  %v375_v6 = vsel %vm367_vm7, %v373_v31, %v374_v60  ;;  %v1031_v7 = vadd.f32 %v372_v54, %v344_v61  ;;  %v308_v11 = vadd.f32 %v285_v4, %v247_v19 }
  0xc5   : > { %v1033_v8 = vadd.f32 %v370_v56, %v343_v62  ;;  %v346_v9 = vadd.f32 %v324_v3, %v309_v63  ;;  %v377_v10 = vsel %vm367_vm7, %v374_v60, %v376_v0  ;;  %v250_v12 = vmul.f32 -0.125, %v240_v1 }
  0xc6   : > { %v260_v13 = vmul.f32 -0.375, %v240_v1  ;;  %v261_v14 = vmul.f32 -0.375, %v241_v2  ;;  %v1037_v15 = vmul.f32 -0.375, %v1031_v7  ;;  %v353_v18 = vmul.f32 -0.125, %v241_v2 }
  0xc7   : > { %v1040_v16 = vmul.f32 -0.375, %v1033_v8  ;;  %v1042_v17 = vadd.f32 %v377_v10, %v346_v9  ;;  %v345_v21 = vadd.f32 %v322_v5, %v308_v11  ;;  %v379_v26 = vrot.slane %v250_v12, 3 }
  0xc8   : > { %v289_v22 = vrot.slane %v260_v13, 1  ;;  %v291_v23 = vrot.slane %v261_v14, 1  ;;  %v326_v24 = vrot.slane %v260_v13, 2  ;;  %430 = vrot.lane.b32.xlu1 %v1037_v15, %s852_s27  ;;  %v328_v25 = vrot.slane %v261_v14, 2 }
  0xc9   : > { %428 = vrot.lane.b32.xlu0 %v1040_v16, %s852_s27  ;;  %v1049_v19 = vmul.f32 -0.375, %v1042_v17  ;;  %v381_v27 = vrot.slane %v353_v18, 3  ;;  %v1051_v28 = vadd.f32 %v375_v6, %v345_v21  ;;  %v249_v30 = vmul.f32 -0.125, %v239_v20 }
  0xca   : > { %v292_v29 = vsel %vm277_vm5, %v289_v22, %v291_v23  ;;  %v259_v31 = vmul.f32 -0.375, %v239_v20  ;;  %v329_v35 = vsel %vm314_vm6, %v326_v24, %v328_v25  ;;  %v252_v37 = vmul.f32 -0.125, %v243_v32 }
  0xcb   : > { %v311_v34 = vadd.f32 %v292_v29, %v250_v12  ;;  %v382_v36 = vsel %vm367_vm7, %v379_v26, %v381_v27  ;;  %v414_v38 = vmul.f32 -0.375, %v1051_v28  ;;  %v378_v41 = vrot.slane %v249_v30, 3 }
  0xcc   : > { %v288_v39 = vrot.slane %v259_v31, 1  ;;  %v325_v40 = vrot.slane %v259_v31, 2  ;;  %434 = vrot.lane.b32.xlu1 %v1049_v19, %s852_s27  ;;  %v263_v43 = vmul.f32 -0.375, %v243_v32  ;;  %v264_v44 = vmul.f32 -0.375, %v244_v33 }
  0xcd   : > { %v348_v42 = vadd.f32 %v329_v35, %v311_v34  ;;  %v354_v45 = vmul.f32 -0.125, %v244_v33  ;;  %432 = vrot.lane.b32.xlu0 %v414_v38, %s852_s27  ;;  %v380_v48 = vsel %vm367_vm7, %v378_v41, %v379_v26  ;;  %v384_v49 = vrot.slane %v252_v37, 3 }
  0xce   : > { %v290_v46 = vsel %vm277_vm5, %v288_v39, %v289_v22  ;;  %v327_v47 = vsel %vm314_vm6, %v325_v40, %v326_v24  ;;  %v294_v53 = vrot.slane %v263_v43, 1  ;;  %v296_v54 = vrot.slane %v264_v44, 1 }
  0xcf   : > { %v401_v51 = vadd.f32 %v382_v36, %v348_v42  ;;  %v310_v52 = vadd.f32 %v290_v46, %v249_v30  ;;  %v331_v55 = vrot.slane %v263_v43, 2  ;;  %v333_v56 = vrot.slane %v264_v44, 2 }
  0xd0   : > { %v386_v57 = vrot.slane %v354_v45, 3  ;;  %v251_v58 = vmul.f32 -0.125, %v242_v50  ;;  %v297_v61 = vsel %vm277_vm5, %v294_v53, %v296_v54  ;;  %v262_v62 = vmul.f32 -0.375, %v242_v50 }
  0xd1   : > { %v417_v59 = vmul.f32 -0.375, %v401_v51  ;;  %v347_v60 = vadd.f32 %v327_v47, %v310_v52  ;;  %v313_v63 = vadd.f32 %v297_v61, %v252_v37  ;;  %v334_v0 = vsel %vm314_vm6, %v331_v55, %v333_v56 }
  0xd2   : > { %v387_v1 = vsel %vm367_vm7, %v384_v49, %v386_v57  ;;  %v293_v3 = vrot.slane %v262_v62, 1  ;;  %v330_v4 = vrot.slane %v262_v62, 2  ;;  %v383_v5 = vrot.slane %v251_v58, 3 }
  0xd3   : > { %438 = vrot.lane.b32.xlu1 %v417_v59, %s852_s27  ;;  %v400_v2 = vadd.f32 %v380_v48, %v347_v60  ;;  %v350_v6 = vadd.f32 %v334_v0, %v313_v63  ;;  %v405_v23 = vmul.f32 -0.125, %v1031_v7  ;;  %v404_v24 = vmul.f32 -0.125, %v1033_v8 }
  0xd4   : > { %v295_v10 = vsel %vm277_vm5, %v293_v3, %v294_v53  ;;  %v332_v11 = vsel %vm314_vm6, %v330_v4, %v331_v55  ;;  %v385_v14 = vsel %vm367_vm7, %v383_v5, %v384_v49  ;;  %v407_v25 = vmul.f32 -0.125, %v1042_v17 }
  0xd5   : > { %v416_v9 = vmul.f32 -0.375, %v400_v2  ;;  %v403_v12 = vadd.f32 %v387_v1, %v350_v6  ;;  %v312_v13 = vadd.f32 %v295_v10, %v251_v58 }
  0xd7   : > { %436 = vrot.lane.b32.xlu0 %v416_v9, %s852_s27  ;;  %v419_v18 = vmul.f32 -0.375, %v403_v12  ;;  %v349_v20 = vadd.f32 %v332_v11, %v312_v13  ;;  %v411_v26 = vmul.f32 -0.125, %v403_v12 }
  0xd9   : > { %442 = vrot.lane.b32.xlu1 %v419_v18, %s852_s27  ;;  %v402_v21 = vadd.f32 %v385_v14, %v349_v20 }
  0xdb   : > { %v418_v22 = vmul.f32 -0.375, %v402_v21  ;;  %v410_v27 = vmul.f32 -0.125, %v402_v21 }
  0xdd   : > { %440 = vrot.lane.b32.xlu0 %v418_v22, %s852_s27  ;;  %462 = vrot.lane.b32.xlu1 %v1037_v15, %s853_s29  ;;  %v406_v15 = vmul.f32 -0.125, %v1051_v28 }
  0xe1   : > { %460 = vrot.lane.b32.xlu0 %v1040_v16, %s853_s29  ;;  %466 = vrot.lane.b32.xlu1 %v1049_v19, %s853_s29  ;;  %v409_v16 = vmul.f32 -0.125, %v401_v51  ;;  %v408_v19 = vmul.f32 -0.125, %v400_v2 }
  0xe5   : > { %464 = vrot.lane.b32.xlu0 %v414_v38, %s853_s29  ;;  %470 = vrot.lane.b32.xlu1 %v417_v59, %s853_s29 }
  0xe9   : > { %468 = vrot.lane.b32.xlu0 %v416_v9, %s853_s29  ;;  %474 = vrot.lane.b32.xlu1 %v419_v18, %s853_s29 }
  0xed   : > { %472 = vrot.lane.b32.xlu0 %v418_v22, %s853_s29  ;;  %502 = vrot.lane.b32.xlu1 %v405_v23, %s854_s30 }
  0xf1   : > { %500 = vrot.lane.b32.xlu0 %v404_v24, %s854_s30  ;;  %506 = vrot.lane.b32.xlu1 %v407_v25, %s854_s30 }
  0xf5   : > { %504 = vrot.lane.b32.xlu0 %v406_v15, %s854_s30  ;;  %510 = vrot.lane.b32.xlu1 %v409_v16, %s854_s30 }
  0xf9   : > { %508 = vrot.lane.b32.xlu0 %v408_v19, %s854_s30  ;;  %514 = vrot.lane.b32.xlu1 %v411_v26, %s854_s30 }
  0xfd   : > { %512 = vrot.lane.b32.xlu0 %v410_v27, %s854_s30 }
 0x13a   : > { %v431_v7 = vpop.permute.xlu1 %430 }
 0x13b   : > { %v429_v29 = vpop.permute.xlu0 %428  ;;  %v453_v40 = vadd.f32 %v431_v7, %v405_v23 }
 0x13c   : > { %v452_v44 = vadd.f32 %v429_v29, %v404_v24 }
 0x13e   : > { %v435_v30 = vpop.permute.xlu1 %434 }
 0x13f   : > { %v433_v31 = vpop.permute.xlu0 %432  ;;  %v455_v45 = vadd.f32 %v435_v30, %v407_v25 }
 0x140   : > { %v454_v51 = vadd.f32 %v433_v31, %v406_v15 }
 0x145   : > { %v439_v8 = vpop.permute.xlu1 %438 }
 0x146   : > { %v457_v52 = vadd.f32 %v439_v8, %v409_v16 }
 0x149   : > { %v437_v32 = vpop.permute.xlu0 %436 }
 0x14a   : > { %v456_v59 = vadd.f32 %v437_v32, %v408_v19 }
 0x14b   : > { %v443_v17 = vpop.permute.xlu1 %442 }
 0x14c   : > { %v459_v60 = vadd.f32 %v443_v17, %v411_v26 }
 0x14f   : > { %v441_v33 = vpop.permute.xlu0 %440  ;;  %v463_v34 = vpop.permute.xlu1 %462 }
 0x150   : > { %v485_v41 = vadd.f32 %v463_v34, %v453_v40  ;;  %v458_v3 = vadd.f32 %v441_v33, %v410_v27 }
 0x153   : > { %v461_v35 = vpop.permute.xlu0 %460  ;;  %v467_v28 = vpop.permute.xlu1 %466 }
 0x154   : > { %v484_v47 = vadd.f32 %v461_v35, %v452_v44  ;;  %v487_v48 = vadd.f32 %v467_v28, %v455_v45 }
 0x157   : > { %v465_v36 = vpop.permute.xlu0 %464  ;;  %v471_v37 = vpop.permute.xlu1 %470 }
 0x158   : > { %v486_v55 = vadd.f32 %v465_v36, %v454_v51  ;;  %v489_v56 = vadd.f32 %v471_v37, %v457_v52 }
 0x15b   : > { %v469_v38 = vpop.permute.xlu0 %468  ;;  %v475_v39 = vpop.permute.xlu1 %474 }
 0x15c   : > { %v488_v63 = vadd.f32 %v469_v38, %v456_v59  ;;  %v491_v0 = vadd.f32 %v475_v39, %v459_v60 }
 0x15f   : > { %v473_v42 = vpop.permute.xlu0 %472  ;;  %v503_v43 = vpop.permute.xlu1 %502 }
 0x160   : > { %v525_v46 = vadd.f32 %v503_v43, %v485_v41  ;;  %v490_v6 = vadd.f32 %v473_v42, %v458_v3 }
 0x162   : > { %534 = vst.msk [vmem:[%s1082_s2 + $0x8] sm:$0xff] %vm532_vm8, %v525_v46 }
 0x163   : > { %v501_v49 = vpop.permute.xlu0 %500  ;;  %v507_v50 = vpop.permute.xlu1 %506 }
 0x164   : > { %v524_v53 = vadd.f32 %v501_v49, %v484_v47  ;;  %v527_v54 = vadd.f32 %v507_v50, %v487_v48 }
 0x166   : > { %533 = vst.msk [vmem:[%s1082_s2] sm:$0xff] %vm532_vm8, %v524_v53  ;;  %536 = vst.msk [vmem:[%s1082_s2 + $0x18] sm:$0xff] %vm532_vm8, %v527_v54 }
 0x167   : > { %v505_v57 = vpop.permute.xlu0 %504  ;;  %v511_v58 = vpop.permute.xlu1 %510 }
 0x168   : > { %v526_v61 = vadd.f32 %v505_v57, %v486_v55  ;;  %v529_v62 = vadd.f32 %v511_v58, %v489_v56 }
 0x16a   : > { %535 = vst.msk [vmem:[%s1082_s2 + $0x10] sm:$0xff] %vm532_vm8, %v526_v61  ;;  %538 = vst.msk [vmem:[%s1082_s2 + $0x28] sm:$0xff] %vm532_vm8, %v529_v62 }
 0x16b   : > { %v509_v1 = vpop.permute.xlu0 %508  ;;  %v515_v2 = vpop.permute.xlu1 %514 }
 0x16c   : > { %v528_v4 = vadd.f32 %v509_v1, %v488_v63  ;;  %v531_v5 = vadd.f32 %v515_v2, %v491_v0 }
 0x16e   : > { %537 = vst.msk [vmem:[%s1082_s2 + $0x20] sm:$0xff] %vm532_vm8, %v528_v4  ;;  %540 = vst.msk [vmem:[%s1082_s2 + $0x38] sm:$0xff] %vm532_vm8, %v531_v5 }
 0x16f   : > { %v513_v9 = vpop.permute.xlu0 %512 }
 0x170   : > { %v530_v10 = vadd.f32 %v513_v9, %v490_v6 }
 0x172   : > { %539 = vst.msk [vmem:[%s1082_s2 + $0x30] sm:$0xff] %vm532_vm8, %v530_v10 }
 0x173   : > { %776 = shalt.err (!%p773_p5)
}
 0x174   : > { %s777_s25 = scalar_lea.hbm %s1103_s16, 1024  ;;  %s781_s4 = scalar_lea.hbm %s1157_s1, 2048 }
 0x175   : > { %p778_p4 = scmp.ne.s32.totalorder %s1103_s16, %s777_s25  ;;  %p782_p12 = scmp.lt.u32.totalorder %s1103_s16, %s1157_s1 }
 0x176   : > { %p783_p1 = scmp.lt.u32.totalorder %s781_s4, %s777_s25  ;;  %p785_p8 = scmp.lt.u32.totalorder %s777_s25, %s1103_s16 }
 0x177   : > { %p779_p7 = pnand %p778_p4, %p1165_p9 }
 0x178   : > { %p784_p3 = por %p783_p1, %p782_p12 }
 0x179   : > { %p780_p10 = pneg %p779_p7 }
 0x17a   : > { %p786_p11 = por %p785_p8, %p784_p3 }
 0x17c   : > { %p787_p0 = pnand %p786_p11, %p780_p10 }
 0x17e   : > { %790 = shalt.err (!%p787_p0)
}
 0x17f   : > { %s856_s29 = smov 128   ;;  %s857_s30 = smov 8  }
 0x180   : > { %664 = dma.vmem_to_hbm [thread:$0]  (%p1165_p9), %s1105_s12, 1024, %s1103_s16, %s542_s9, %s856_s29, %s856_s29, %s857_s30  }
 0x181 PF: > { %s573_s2 = sand.u32 1, %s825_s6   ;;  %p1166_p6 = scmp.ne.s32.totalorder %s1162_s21, 0 }
 0x182   : > { %p1167_p13 = scmp.ge.s32.totalorder %s845_s11, 2  ;;  %s574_s5 = scalar_lea.sflag [#allocation5], %s573_s2 }
 0x184   : > { %p671_p2 = pnand %p1167_p13, %p1166_p6 }
 0x186   : > { %820 = dma.done.wait (!%p671_p2), %s574_s5, 1024  }
 0x187   : > { %822 = vsyncadd (!%p671_p2), %s574_s5, 4294966272  ;;  %s17_s11 = sadd.s32 1, %s845_s11   ;;  %s1168_s6 = smov %s829_s7 }
 0x188   : > { %p14_p5 = scmp.ge.s32.totalorder %s17_s11, 4   ;;  %s1169_s7 = smov %s833_s8 }
 0x189   : > { %s1170_s8 = smov %s924_s20  ;;  %s1171_s9 = smov %s841_s10 }
 0x18a   : > { %s1172_s10 = smov %s1174_s14  ;;  %16 = sbr.rel (!%p14_p5) target bundleno = 6 (0x6), region = 69 }
 0x191   :  { %579 = vsyncpa [#allocation4], 1 }
 0x192   :  { %581 = vsyncpa [#allocation4 + $0x1], 1 }
 0x193   :  { %582 = vsyncpa [#allocation5], 1 }
 0x194   :  { %584 = vsyncpa [#allocation5 + $0x1], 1 }

</bundles_post_ra>
